<compile_context>
chip_gen: v7x
topology: tpu7x:2x2x1
jax: 0.10.0
libtpu: 0.0.40
codegen_flags: <defaults>
</compile_context>

<pallas_src>
import jax
import jax.numpy as jnp
from jax.experimental import pallas as pl
from jax.experimental.pallas import tpu as pltpu


# ----------------------------- Pallas kernel --------------------------------

def _conv1x1_bn_kernel(x_ref, w_ref, b_ref, o_ref):
    # x_ref: (1, C, ts) f32 activations; w_ref: (N, C) bf16 (BN scale folded in);
    # b_ref: (N, 1) f32 folded BN bias; o_ref: (1, N, ts) out dtype.
    a = x_ref[0].astype(jnp.bfloat16)                            # cast on the VMEM tile
    y = jnp.dot(w_ref[...], a, preferred_element_type=jnp.float32)  # f32 MXU accumulation
    o_ref[0] = (y + b_ref[...]).astype(o_ref.dtype)


def _choose_spatial_tile(S, C, N, out_bytes, n_batch,
                         vmem_budget=24 << 20, ts_max=2048):
    """Lane-dense spatial tile from a VMEM budget; keep >=2 grid steps for v7x."""
    per_col = 2 * (C * 4) + 2 * (N * out_bytes)      # double-buffered act + out per column
    ts = max(128, min(ts_max, vmem_budget // max(per_col, 1)))
    ts = (ts // 128) * 128
    if S <= ts:
        if n_batch == 1 and S > 128:
            # Split the spatial axis so both v7x TensorCores get a tile even at batch 1.
            half = (((S + 1) // 2) + 127) // 128 * 128
            return min(S, half)
        return S                                      # single full-extent block
    return ts


def fused_conv1x1_bn_nchw(x_flat, w_bf, bias, *, out_dtype=jnp.bfloat16):
    """out[b, n, s] = sum_c w_bf[n, c] * x_flat[b, c, s] + bias[n]  (channel-major GEMM)."""
    B, C, S = x_flat.shape
    N = w_bf.shape[0]
    out_bytes = jnp.dtype(out_dtype).itemsize

    ts = _choose_spatial_tile(S, C, N, out_bytes, B)
    n_s = pl.cdiv(S, ts)                              # ragged last tile -> Pallas masks it
    bias2 = bias.reshape(N, 1).astype(jnp.float32)

    # VMEM budget derived from the actual tile footprint (resident weights + bias,
    # double-buffered activation + output tiles), capped well under v7x's 64 MiB.
    footprint = (N * C * 2 + N * 4
                 + 2 * (C * ts * 4)
                 + 2 * (N * ts * out_bytes))
    vmem_limit = int(min(max(footprint + (8 << 20), 32 << 20), 48 << 20))

    return pl.pallas_call(
        _conv1x1_bn_kernel,
        out_shape=jax.ShapeDtypeStruct((B, N, S), out_dtype),
        grid_spec=pltpu.PrefetchScalarGridSpec(
            num_scalar_prefetch=0,
            grid=(B, n_s),
            in_specs=[
                # Activations: pipelined per (batch, spatial block).  If profiling on
                # v7x shows exposed DMA, add pipeline_mode=pl.Buffered(3) here.
                pl.BlockSpec((1, C, ts), lambda b, s: (b, 0, s)),
                pl.BlockSpec((N, C), lambda b, s: (0, 0)),   # folded weights (resident)
                pl.BlockSpec((N, 1), lambda b, s: (0, 0)),   # folded BN bias (resident)
            ],
            out_specs=pl.BlockSpec((1, N, ts), lambda b, s: (b, 0, s)),
        ),
        compiler_params=pltpu.CompilerParams(
            dimension_semantics=("parallel", "parallel"),
            vmem_limit_bytes=vmem_limit,
        ),
    )(x_flat, w_bf, bias2)


# ------------------------------- glue (JAX) ----------------------------------

def fold_bn_into_conv(params, planes=None, eps=1e-5, mxu_dtype=jnp.bfloat16):
    """Fold eval-mode BN into the 1x1 conv weight/bias.

    Cheap; hoist out of the per-step inference path when possible.
    `planes` must be a static Python int (dynamic-width slicing is host-side).
    For very large C_in where bf16 MXU operands are a numerics concern, pass
    mxu_dtype=jnp.float32.
    """
    w = params["conv"]                                # (out_planes, in_planes, 1, 1), OIHW
    gamma, beta, mean, var = params["bn"]
    if planes is not None:
        w = w[:planes]
        gamma, beta, mean, var = gamma[:planes], beta[:planes], mean[:planes], var[:planes]
    scale = gamma / jnp.sqrt(var + eps)
    bias = beta - mean * scale
    w_mat = (w[:, :, 0, 0] * scale[:, None]).astype(mxu_dtype)   # (N, C), BN scale folded
    return w_mat, bias


def dynamic_shortcut_forward(x_nchw, params, stride, planes=None,
                             out_dtype=jnp.bfloat16):
    """DynamicShortCut.forward: BN(conv1x1(x, stride)), eval-mode BN, NCHW in / NCHW out."""
    w_bf, bias = fold_bn_into_conv(params, planes)
    B, C, H, W = x_nchw.shape
    if stride != 1:
        # Only remaining pre-pass: strided spatial subsample (writes 1/stride^2 of x).
        x_nchw = x_nchw[:, :, ::stride, ::stride]
    Ho, Wo = x_nchw.shape[2], x_nchw.shape[3]
    x_flat = x_nchw.reshape(B, C, Ho * Wo)            # contiguous reshape -> free
    out = fused_conv1x1_bn_nchw(x_flat, w_bf, bias, out_dtype=out_dtype)
    return out.reshape(B, w_bf.shape[0], Ho, Wo)      # already NCHW; reshape is free


# --------------------------- pure-JAX reference -------------------------------

def reference_forward(x, params, stride, planes=None, eps=1e-5):
    w = params["conv"]
    gamma, beta, mean, var = params["bn"]
    if planes is not None:
        w = w[:planes]
        gamma, beta, mean, var = gamma[:planes], beta[:planes], mean[:planes], var[:planes]
    y = jax.lax.conv_general_dilated(
        x, w, (stride, stride), [(0, 0), (0, 0)],
        dimension_numbers=("NCHW", "OIHW", "NCHW"),
        precision=jax.lax.Precision.HIGHEST)
    sh = (1, -1, 1, 1)
    return ((y - mean.reshape(sh)) / jnp.sqrt(var.reshape(sh) + eps)
            * gamma.reshape(sh) + beta.reshape(sh))


# ---------------------------------- main --------------------------------------

if __name__ == "__main__":
    key = jax.random.PRNGKey(0)
    in_planes, out_planes, stride = 4, 8, 2
    B, H, W = 2, 16, 16

    ks = jax.random.split(key, 6)
    x = jax.random.normal(ks[0], (B, in_planes, H, W), jnp.float32)
    params = {
        "conv": jax.random.normal(ks[1], (out_planes, in_planes, 1, 1), jnp.float32) * 0.1,
        "bn": (
            jax.random.normal(ks[2], (out_planes,), jnp.float32) * 0.1 + 1.0,   # gamma
            jax.random.normal(ks[3], (out_planes,), jnp.float32) * 0.1,         # beta
            jax.random.normal(ks[4], (out_planes,), jnp.float32) * 0.1,         # running mean
            jax.random.uniform(ks[5], (out_planes,), jnp.float32, 0.5, 1.5),    # running var
        ),
    }

    # Full-width forward (stride 2).
    out = jax.block_until_ready(dynamic_shortcut_forward(x, params, stride))
    ref = jax.block_until_ready(reference_forward(x, params, stride))
    assert out.shape == ref.shape == (B, out_planes, H // stride, W // stride), out.shape
    err = float(jnp.max(jnp.abs(out.astype(jnp.float32) - ref)))
    assert jnp.allclose(out.astype(jnp.float32), ref, atol=2e-2, rtol=2e-2), err

    # Dynamic-width forward (planes=6), matching DynamicConv2d/DynamicBatchNorm2d slicing.
    out_d = jax.block_until_ready(dynamic_shortcut_forward(x, params, stride, planes=6))
    ref_d = jax.block_until_ready(reference_forward(x, params, stride, planes=6))
    assert out_d.shape == ref_d.shape == (B, 6, H // stride, W // stride), out_d.shape
    err_d = float(jnp.max(jnp.abs(out_d.astype(jnp.float32) - ref_d)))
    assert jnp.allclose(out_d.astype(jnp.float32), ref_d, atol=2e-2, rtol=2e-2), err_d

    # Stride-1 path (no pre-pass at all): x feeds the kernel directly in NCHW.
    out_s1 = jax.block_until_ready(dynamic_shortcut_forward(x, params, 1))
    ref_s1 = jax.block_until_ready(reference_forward(x, params, 1))
    err_s1 = float(jnp.max(jnp.abs(out_s1.astype(jnp.float32) - ref_s1)))
    assert jnp.allclose(out_s1.astype(jnp.float32), ref_s1, atol=2e-2, rtol=2e-2), err_s1

    print("KERNEL_OK")
</pallas_src>

<mosaic_0001>
module attributes {stable_mosaic.version = 11 : i64} {
  func.func @_conv1x1_bn_kernel(%arg0: i32, %arg1: i32, %arg2: memref<1x4x64xf32, #tpu.memory_space<vmem>>, %arg3: memref<8x4xbf16, #tpu.memory_space<vmem>>, %arg4: memref<8x1xf32, #tpu.memory_space<vmem>>, %arg5: memref<1x8x64xbf16, #tpu.memory_space<vmem>>) attributes {dimension_semantics = [#tpu.dimension_semantics<parallel>, #tpu.dimension_semantics<parallel>], iteration_bounds = array<i64: 2, 1>, scalar_prefetch = 0 : i64, scratch_operands = 0 : i64, tpu.core_type = #tpu.core_type<tc>, window_params = [{transform_indices = @transform_0, window_bounds = array<i64: 1, 4, 64>}, {pipeline_mode = #tpu.pipeline_mode<synchronous>, transform_indices = @transform_1, window_bounds = array<i64: 8, 4>}, {pipeline_mode = #tpu.pipeline_mode<synchronous>, transform_indices = @transform_2, window_bounds = array<i64: 8, 1>}, {transform_indices = @transform_3, window_bounds = array<i64: 1, 8, 64>}]} {
    %c0 = arith.constant 0 : index
    %c0_0 = arith.constant 0 : index
    %c0_1 = arith.constant 0 : index
    %0 = vector.load %arg2[%c0, %c0_0, %c0_1] : memref<1x4x64xf32, #tpu.memory_space<vmem>>, vector<1x4x64xf32>
    %1 = vector.shape_cast %0 : vector<1x4x64xf32> to vector<4x64xf32>
    %2 = arith.truncf %1 : vector<4x64xf32> to vector<4x64xbf16>
    %c0_2 = arith.constant 0 : index
    %c0_3 = arith.constant 0 : index
    %3 = vector.load %arg3[%c0_2, %c0_3] : memref<8x4xbf16, #tpu.memory_space<vmem>>, vector<8x4xbf16>
    %cst = arith.constant dense<0.000000e+00> : vector<8x64xf32>
    %4 = tpu.matmul %3, %2, %cst {dimension_numbers = #tpu.dot_dimension_numbers<[1], [0], [0], [1], [0, 0, 1, 1], [], []>} : vector<8x4xbf16>, vector<4x64xbf16>, vector<8x64xf32> -> vector<8x64xf32>
    %c0_4 = arith.constant 0 : index
    %c0_5 = arith.constant 0 : index
    %5 = vector.load %arg4[%c0_4, %c0_5] : memref<8x1xf32, #tpu.memory_space<vmem>>, vector<8x1xf32>
    %6 = vector.broadcast %5 : vector<8x1xf32> to vector<8x64xf32>
    %7 = arith.addf %4, %6 : vector<8x64xf32>
    %8 = arith.truncf %7 : vector<8x64xf32> to vector<8x64xbf16>
    %c0_6 = arith.constant 0 : index
    %c0_7 = arith.constant 0 : index
    %c0_8 = arith.constant 0 : index
    %9 = vector.load %arg5[%c0_6, %c0_7, %c0_8] : memref<1x8x64xbf16, #tpu.memory_space<vmem>>, vector<1x8x64xbf16>
    %10 = vector.shape_cast %9 : vector<1x8x64xbf16> to vector<8x64xbf16>
    %11 = vector.shape_cast %8 : vector<8x64xbf16> to vector<1x8x64xbf16>
    tpu.vector_store %arg5[%c0_6, %c0_7, %c0_8], %11 {strides = array<i32>} : memref<1x8x64xbf16, #tpu.memory_space<vmem>>, vector<1x8x64xbf16>,
    return
  }
  func.func @transform_0(%arg0: i32, %arg1: i32) -> (i32, i32, i32) {
    %c0_i32 = arith.constant 0 : i32
    %c0_i32_0 = arith.constant 0 : i32
    return %arg0, %c0_i32, %arg1 : i32, i32, i32
  }
  func.func @transform_1(%arg0: i32, %arg1: i32) -> (i32, i32) {
    %c0_i32 = arith.constant 0 : i32
    %c0_i32_0 = arith.constant 0 : i32
    %c0_i32_1 = arith.constant 0 : i32
    return %c0_i32, %c0_i32_0 : i32, i32
  }
  func.func @transform_2(%arg0: i32, %arg1: i32) -> (i32, i32) {
    %c0_i32 = arith.constant 0 : i32
    %c0_i32_0 = arith.constant 0 : i32
    %c0_i32_1 = arith.constant 0 : i32
    return %c0_i32, %c0_i32_0 : i32, i32
  }
  func.func @transform_3(%arg0: i32, %arg1: i32) -> (i32, i32, i32) {
    %c0_i32 = arith.constant 0 : i32
    %c0_i32_0 = arith.constant 0 : i32
    return %arg0, %c0_i32, %arg1 : i32, i32, i32
  }
}

</mosaic_0001>

<bundles_post_ra>
// kernel: tpu_custom_call.1
= control target key start
LH: loop header
LB: loop body
LE: loop exit
PB: predicated region body
PF: predicated region fallthrough
CT: control target
= control target key end

     0   :  { %8 = vsyncpa [#allocation3], 0  ;;  %s639_s0 = inlined_call_operand.vmem [shape: f32[2,4,64], index: 0, kind: input, shape index: {}]   ;;  %s640_s1 = inlined_call_operand.vmem [shape: bf16[8,4], index: 1, kind: input, shape index: {}]   ;;  %s641_s2 = inlined_call_operand.vmem [shape: f32[8,1], index: 2, kind: input, shape index: {}]   ;;  %s642_s3 = inlined_call_operand.hbm [shape: bf16[2,8,64], index: 3, kind: output, shape index: {}]  }
   0x1   :  { %10 = vsyncpa [#allocation3 + $0x1], 0  ;;  %s521_s12 = smov 0   ;;  %s523_s13 = smov 0  }
   0x2   :  { %s525_s14 = smov 0   ;;  %s527_s15 = smov 0  }
   0x3   :  { %s529_s16 = smov 0   ;;  %s531_s17 = smov 0  }
   0x4 LB: > { %s338_s18 = sadd.s32 4294967295, %s495_s17   ;;  %s339_s19 = sadd.s32 4294967294, %s495_s17   ;;  %s495_s17 = sphi %s531_s17, %s16_s17   ;;  %s491_s16 = sphi %s529_s16, %s649_s16   ;;  %s487_s15 = sphi %s527_s15, %s648_s15   ;;  %s483_s14 = sphi %s525_s14, %s647_s14   ;;  %s479_s13 = sphi %s523_s13, %s646_s13   ;;  %s475_s12 = sphi %s521_s12, %s645_s12  }
   0x5   : > { %s28_s20 = sadd.s32 1, %s491_s16  ;;  %s107_s21 = sadd.s32 1, %s483_s14 }
   0x6   : > { %p30_p0 = scmp.ge.s32.totalorder %s28_s20, 2  ;;  %p117_p1 = scmp.ne.s32.totalorder %s483_s14, %s479_s13 }
   0x7   : > { %p118_p2 = scmp.eq.s32.totalorder %s338_s18, 1  ;;  %p123_p3 = scmp.ne.s32.totalorder %s479_s13, %s475_s12 }
   0x8   : > { %s651_s20 = smov (%p30_p0, %s28_s20), 0  ;;  %p124_p5 = scmp.eq.s32.totalorder %s339_s19, 1 }
   0x9   : > { %p561_p4 = por %p118_p2, %p117_p1  ;;  %s102_s23 = ssub.s32 %s491_s16, %s651_s20 }
   0xa   : > { %p342_p6 = scmp.ge.s32.totalorder %s495_s17, 1  ;;  %p105_p7 = scmp.eq.s32.totalorder %s102_s23, 0 }
   0xb   : > { %p568_p8 = por %p124_p5, %p123_p3  ;;  %p158_p9 = scmp.lt.s32.totalorder %s495_s17, 3 }
   0xc   : > { %s574_s25 = scalar_select %p105_p7, %s483_s14, %s107_s21  }
   0xd   : > { %p159_p10 = pnand %p342_p6, %p158_p9 }
   0xe   : > { %p184_p11 = scmp.lt.s32.totalorder (!%p159_p10), %s487_s15, 1  ;;  %v497_v0 = vmov (!%p159_p10), 0.0   ;;  %vm498_vm0 = vmmov (!%p159_p10), 0   ;;  %v195_v1 = vld [vmem:[%s641_s2] sm:$0xff] (!%p159_p10)  ;;  %v499_v2 = vmov (!%p159_p10), 0   ;;  %vm205_vm1 = vcmask (!%p159_p10), 1041408  }
   0xf   : > { %162 = sbr.rel (%p159_p10) target bundleno = 263 (0x107), region = 32  ;;  %352 = vmatprep.subr.bf16.mxu0 (!%p159_p10), %v497_v0  ;;  %354 = vmatprep.mubr.msk.bf16.mxu0 (!%p159_p10), %vm498_vm0, %v497_v0  ;;  %v194_v6 = vld [vmem:[%s640_s1] sm:$0xf] (!%p159_p10)  ;;  %vm201_vm2 = vcmask (!%p159_p10), 31744   ;;  %s181_s8 = sand.u32 (!%p159_p10), 1, %s479_s13   ;;  %vm250_vm3 = vcmask (!%p159_p10), 519168  }
  0x10   : > { %416 = vset.pattern.permute.xlu0 (!%p159_p10), %v499_v2  ;;  %s343_s9 = sshll.u32 (!%p159_p10), %s181_s8, 2  ;;  %s347_s10 = sshll.u32 (!%p159_p10), %s487_s15, 6 }
  0x11   : > { %198 = vperm.xlu0 (!%p159_p10), %416, %v195_v1   ;;  %s183_s11 = scalar_lea.vmem (!%p159_p10), [#allocation2], %s343_s9  ;;  %s592_s23 = scalar_lea.hbm (!%p159_p10), %s642_s3, %s347_s10 }
  0x12   : > { %s267_s18 = sshll.u32 (!%p159_p10), %s183_s11, 4  ;;  %s500_s27 = smov (!%p159_p10), [#allocation2]   ;;  %s594_s18 = int_to_ptr.vmem [resolvable:$true] %s267_s18 }
  0x13   : > { %s417_s26 = scalar_lea.vmem (!%p159_p10), %s594_s18, 64 }
  0x14   : > { %p418_p12 = scmp.ne.s32.totalorder (!%p159_p10), %s594_s18, %s417_s26 }
  0x16   : > { %s185_s28 = scalar_select %p184_p11, %s487_s15, 1 }
  0x17   : > { %s253_s15 = scalar_lea.sflag [#allocation3], %s181_s8  ;;  %p419_p13 = pnand %p418_p12, %p561_p4 }
  0x18   : > { %s344_s29 = sshll.u32 %s185_s28, 2  ;;  %s421_s28 = sshll.u32 %s500_s27, 4  ;;  %s422_s28 = int_to_ptr.vmem [resolvable:$false] %s421_s28 }
  0x19   : > { %s190_s5 = scalar_lea.vmem %s639_s0, %s344_s29  ;;  %p420_p0 = pneg %p419_p13 }
  0x1a   : > { %v192_v3 = vld [vmem:[%s190_s5] sm:$0xf]  ;;  %s423_s29 = scalar_lea.vmem %s422_s28, 128  ;;  %p424_p1 = scmp.lt.s32.totalorder %s594_s18, %s422_s28 }
  0x1b   : > { %v193_v4 = vpack.c.bf16 %v192_v3, %v192_v3  ;;  %p425_p2 = scmp.lt.s32.totalorder %s423_s29, %s417_s26 }
  0x1d   : > { %v207_v5 = vsel %vm205_vm1, %v193_v4, 0  ;;  %p426_p3 = por %p425_p2, %p424_p1 }
  0x1e   : > { %353 = vmatpush3.bf16.msra.mxu0 %v207_v5 }
  0x1f   : > { %p427_p5 = pnand %p426_p3, %p420_p0 }
  0x21   : > { %355 = vmatmul.mubr.msk.bf16.vlgmr.msra.gmra.mrb[0].mxu0 %vm201_vm2, %v194_v6 }
  0x90   : > { %v199_v7 = vpop.permute.xlu0 %198 }
  0xf4   : > { %v243_v8 = vpop.f32.mrb[0].mxu0 }
  0xf5   : > { %v244_v9 = vadd.f32 %v243_v8, %v199_v7  ;;  %v356_v10 = vpop.f32.mrb[1].mxu0 }
  0xf6   : > { %v246_v11 = vpop.f32.mrb[2].mxu0 }
  0xf7   : > { %v249_v12 = vpack.c.bf16 %v244_v9, %v244_v9  ;;  %v357_v13 = vpop.f32.mrb[3].mxu0 }
  0xf9   : > { %251 = vst.msk [vmem:[%s183_s11] sm:$0xf] %vm250_vm3, %v249_v12 }
  0xfa   : > { %430 = shalt.err (!%p427_p5)
}
  0xfb   : > { %s431_s30 = scalar_lea.hbm %s592_s23, 64  ;;  %s435_s6 = scalar_lea.hbm %s642_s3, 128 }
  0xfc   : > { %p432_p6 = scmp.ne.s32.totalorder %s592_s23, %s431_s30  ;;  %p436_p10 = scmp.lt.u32.totalorder %s592_s23, %s642_s3 }
  0xfd   : > { %p437_p11 = scmp.lt.u32.totalorder %s435_s6, %s431_s30  ;;  %p439_p13 = scmp.lt.u32.totalorder %s431_s30, %s592_s23 }
  0xfe   : > { %p433_p7 = pnand %p432_p6, %p561_p4 }
  0xff   : > { %p438_p12 = por %p437_p11, %p436_p10 }
 0x100   : > { %p434_p9 = pneg %p433_p7 }
 0x101   : > { %p440_p0 = por %p439_p13, %p438_p12 }
 0x103   : > { %p441_p1 = pnand %p440_p0, %p434_p9 }
 0x105   : > { %444 = shalt.err (!%p441_p1)
}
 0x106   : > { %358 = dma.vmem_to_hbm [thread:$0]  (%p561_p4), %s594_s18, 64, %s592_s23, %s253_s15  }
 0x107 PF: > { %p364_p2 = scmp.ge.s32.totalorder %s495_s17, 2  ;;  %s279_s9 = sand.u32 1, %s475_s12  }
 0x108   : > { %s280_s10 = scalar_lea.sflag [#allocation3], %s279_s9 }
 0x109   : > { %p361_p3 = pnand %p364_p2, %p568_p8 }
 0x10b   : > { %470 = dma.done.wait (!%p361_p3), %s280_s10, 64  }
 0x10c   : > { %472 = vsyncadd (!%p361_p3), %s280_s10, 4294967232  ;;  %s16_s17 = sadd.s32 1, %s495_s17   ;;  %s645_s12 = smov %s479_s13 }
 0x10d   : > { %p13_p5 = scmp.ge.s32.totalorder %s16_s17, 4   ;;  %s646_s13 = smov %s483_s14 }
 0x10e   : > { %s647_s14 = smov %s574_s25  ;;  %s648_s15 = smov %s491_s16 }
 0x10f   : > { %s649_s16 = smov %s651_s20  ;;  %15 = sbr.rel (!%p13_p5) target bundleno = 4 (0x4), region = 67 }
 0x116   :  { %285 = vsyncpa [#allocation3], 1 }
 0x117   :  { %287 = vsyncpa [#allocation3 + $0x1], 1 }

</bundles_post_ra>
